<compile_context>
chip_gen: v6e
topology: v6e:2x2x1
jax: 0.10.0
libtpu: 0.0.40
codegen_flags: <defaults>
</compile_context>

<pallas_src>
import jax
import jax.numpy as jnp
from jax import lax
from jax.experimental import pallas as pl
from jax.experimental.pallas import tpu as pltpu

N_USERS = 8
N_ITEMS = 8
N = N_USERS + N_ITEMS          # 16 graph nodes
HID = 128                      # latent dim (lane-friendly)
BATCH = 8                      # (users, items, neg_items) triplet batch
BETA = 0.1


def _softplus(v):
    # matches torch.nn.Softplus(beta=1, threshold=20)
    return jnp.where(v > 20.0, v, jnp.log1p(jnp.exp(jnp.minimum(v, 20.0))))


def _softplus_stable(v):
    # numerically stable softplus for logit-space BCE
    return jnp.maximum(v, 0.0) + jnp.log1p(jnp.exp(-jnp.abs(v)))


# ----------------------------------------------------------------------------
# Fused kernel: encoder + reparameterization + one-hot gather + decoder + loss
# ----------------------------------------------------------------------------
def vgae_fused_kernel(adj_ref, emb_ref, noise_ref, idx_ref, w_ref, b_ref,
                      loss_ref):
    # ---- static lane-aligned slices of the packed weight slab ---------------
    w1 = w_ref[:, 0:2 * HID]              # (HID, 2HID)  [w1m | w1s]
    w2m = w_ref[:, 2 * HID:3 * HID]       # (HID, HID)
    w2s = w_ref[:, 3 * HID:4 * HID]       # (HID, HID)
    wd1 = w_ref[:, 4 * HID:5 * HID]       # (HID, HID)

    bslab = b_ref[...]                    # (8, 2HID)
    b1 = bslab[0:1, :]                    # [b1m | b1s]
    b2m = bslab[1:2, :HID]
    b2s = bslab[1:2, HID:]
    bd1 = bslab[2:3, :HID]
    wd2r = bslab[2:3, HID:]               # wd2 as a lane row
    bd2 = bslab[3:4, 0:1]                 # (1, 1)

    # ---- encoder: one-hop dense GCN propagation + mean/std heads ------------
    h = jnp.dot(adj_ref[...], emb_ref[...], preferred_element_type=jnp.float32)
    # layer 1 of both heads in one 128x256 matmul
    h1 = jnp.maximum(
        jnp.dot(h, w1, preferred_element_type=jnp.float32) + b1, 0.0)
    # layer 2: two dense 128x128 matmuls (no zero-padded block diagonal)
    x_mean = jnp.dot(h1[:, :HID], w2m, preferred_element_type=jnp.float32) + b2m
    x_std = _softplus(
        jnp.dot(h1[:, HID:], w2s, preferred_element_type=jnp.float32) + b2s)
    x = noise_ref[...] * x_std + x_mean                         # (N, HID)

    # ---- KL divergence: sum over nodes/dims, averaged over nodes ------------
    kl_sum = jnp.sum(
        -0.5 * (1.0 + 2.0 * jnp.log(x_std) - x_mean * x_mean - x_std * x_std),
        keepdims=True)                                          # (1, 1)

    # ---- vectorized triplet gather via one-hot selection matmuls ------------
    # idx_ref[0] : "left" node ids  = [users        ; users          ]  (2B, 1)
    # idx_ref[1] : "right" node ids = [N_USERS+items; N_USERS+negitm ]  (2B, 1)
    col = lax.broadcasted_iota(jnp.int32, (2 * BATCH, N), 1)
    sel_l = (col == idx_ref[0]).astype(jnp.float32)             # (2B, N)
    sel_r = (col == idx_ref[1]).astype(jnp.float32)             # (2B, N)
    z = (jnp.dot(sel_l, x, preferred_element_type=jnp.float32) *
         jnp.dot(sel_r, x, preferred_element_type=jnp.float32))  # (2B, HID)

    # ---- decoder: ReLU -> Linear -> ReLU -> lane-reduce "Linear(HID->1)" ----
    hz = jnp.maximum(z, 0.0)
    hz = jnp.maximum(
        jnp.dot(hz, wd1, preferred_element_type=jnp.float32) + bd1, 0.0)
    logit = jnp.sum(hz * wd2r, axis=-1, keepdims=True) + bd2    # (2B, 1)

    # BCE in logit space: rows [0,B) are positives, [B,2B) negatives.
    # BCE(sigmoid(l), 1) = softplus(-l); BCE(sigmoid(l), 0) = softplus(l);
    # clamp at 100 to match torch's log clamp at -100.
    row = lax.broadcasted_iota(jnp.int32, (2 * BATCH, 1), 0)
    sgn = jnp.where(row < BATCH, -1.0, 1.0)
    bce = jnp.minimum(_softplus_stable(sgn * logit), 100.0)
    loss_rec = jnp.sum(bce, keepdims=True) / float(BATCH)       # (1, 1)

    loss_ref[...] = loss_rec + BETA * (kl_sum / float(N))


def vgae_forward(adj, emb, noise, packed, users, items, neg_items):
    # pack triplet indices into one int32 VMEM array: (2, 2*BATCH, 1)
    idx_l = jnp.concatenate([users, users]).astype(jnp.int32)
    idx_r = jnp.concatenate(
        [N_USERS + items, N_USERS + neg_items]).astype(jnp.int32)
    idx = jnp.stack([idx_l, idx_r]).reshape(2, 2 * BATCH, 1)

    full2 = lambda shape: pl.BlockSpec(shape, lambda i: (0, 0))
    out = pl.pallas_call(
        vgae_fused_kernel,
        out_shape=jax.ShapeDtypeStruct((1, 1), jnp.float32),
        grid=(1,),
        in_specs=[
            full2((N, N)),                                     # adj
            full2((N, HID)),                                   # emb
            full2((N, HID)),                                   # noise
            pl.BlockSpec((2, 2 * BATCH, 1), lambda i: (0, 0, 0)),  # idx
            full2((HID, 5 * HID)),                             # weight slab
            full2((8, 2 * HID)),                               # bias slab
        ],
        out_specs=full2((1, 1)),
        compiler_params=pltpu.CompilerParams(
            dimension_semantics=("arbitrary",)),
    )(adj, emb, noise, idx, packed["wslab"], packed["bslab"])
    return out[0, 0]


# ----------------------------------------------------------------------------
# parameter init (nn.Linear-style uniform) and one-time packing for the kernel
# ----------------------------------------------------------------------------
def _linear(key, fan_in, fan_out):
    kw, kb = jax.random.split(key)
    bound = 1.0 / jnp.sqrt(fan_in)
    w = jax.random.uniform(kw, (fan_in, fan_out), jnp.float32, -bound, bound)
    b = jax.random.uniform(kb, (1, fan_out), jnp.float32, -bound, bound)
    return w, b


def init_params(key):
    ks = jax.random.split(key, 6)
    p = {}
    p["w1m"], p["b1m"] = _linear(ks[0], HID, HID)
    p["w2m"], p["b2m"] = _linear(ks[1], HID, HID)
    p["w1s"], p["b1s"] = _linear(ks[2], HID, HID)
    p["w2s"], p["b2s"] = _linear(ks[3], HID, HID)
    p["wd1"], p["bd1"] = _linear(ks[4], HID, HID)
    p["wd2"], p["bd2"] = _linear(ks[5], HID, 1)
    return p


def pack_params(p):
    """Pack all weights into one lane-aligned slab and all (1, .) params into one."""
    wslab = jnp.concatenate([
        jnp.concatenate([p["w1m"], p["w1s"]], axis=1),   # cols [0, 256)   : W1
        p["w2m"],                                        # cols [256, 384) : w2m
        p["w2s"],                                        # cols [384, 512) : w2s
        p["wd1"],                                        # cols [512, 640) : wd1
    ], axis=1)                                           # (HID, 5*HID)

    row0 = jnp.concatenate([p["b1m"], p["b1s"]], axis=1)         # B1
    row1 = jnp.concatenate([p["b2m"], p["b2s"]], axis=1)         # B2
    row2 = jnp.concatenate([p["bd1"], p["wd2"].T], axis=1)       # [bd1 | wd2_row]
    row3 = jnp.concatenate(
        [p["bd2"], jnp.zeros((1, 2 * HID - 1), jnp.float32)], axis=1)  # bd2 @ [3,0]
    bslab = jnp.concatenate(
        [row0, row1, row2, row3, jnp.zeros((4, 2 * HID), jnp.float32)], axis=0)
    return {"wslab": wslab, "bslab": bslab}                      # (8, 2*HID)


# ----------------------------------------------------------------------------
# pure-JAX reference (torch-equivalent math, sigmoid + clamped-log BCE)
# ----------------------------------------------------------------------------
def reference_loss(adj, emb, noise, p, users, items, neg_items):
    h = adj @ emb
    x_mean = jnp.maximum(h @ p["w1m"] + p["b1m"], 0.0) @ p["w2m"] + p["b2m"]
    x_std = _softplus(jnp.maximum(h @ p["w1s"] + p["b1s"], 0.0) @ p["w2s"] + p["b2s"])
    x = noise * x_std + x_mean
    x_user, x_item = x[:N_USERS], x[N_USERS:]

    def edge_prob(z):
        hh = jnp.maximum(z, 0.0)
        hh = jnp.maximum(hh @ p["wd1"] + p["bd1"], 0.0)
        return jax.nn.sigmoid(hh @ p["wd2"] + p["bd2"])

    p_pos = edge_prob(x_user[users] * x_item[items])
    p_neg = edge_prob(x_user[users] * x_item[neg_items])
    loss_rec = (-jnp.maximum(jnp.log(p_pos), -100.0)
                - jnp.maximum(jnp.log(1.0 - p_neg), -100.0)).mean()
    kl = (-0.5 * (1.0 + 2.0 * jnp.log(x_std) - x_mean ** 2 - x_std ** 2)).sum(1).mean()
    return loss_rec + BETA * kl


if __name__ == "__main__":
    key = jax.random.PRNGKey(0)
    ks = jax.random.split(key, 8)

    emb = jax.random.normal(ks[0], (N, HID), jnp.float32) * 0.1
    # symmetric-normalized dense bipartite adjacency
    a = (jax.random.uniform(ks[1], (N_USERS, N_ITEMS)) > 0.5).astype(jnp.float32)
    adj = jnp.zeros((N, N), jnp.float32)
    adj = adj.at[:N_USERS, N_USERS:].set(a).at[N_USERS:, :N_USERS].set(a.T)
    deg = jnp.clip(adj.sum(axis=1), 1.0, None)
    adj = adj / jnp.sqrt(deg[:, None]) / jnp.sqrt(deg[None, :])

    noise = jax.random.normal(ks[2], (N, HID), jnp.float32)      # reparam. noise
    users = jax.random.randint(ks[3], (BATCH,), 0, N_USERS)      # int32
    items = jax.random.randint(ks[4], (BATCH,), 0, N_ITEMS)
    neg_items = jax.random.randint(ks[5], (BATCH,), 0, N_ITEMS)
    params = init_params(ks[6])
    packed = pack_params(params)

    loss = vgae_forward(adj, emb, noise, packed, users, items, neg_items)
    loss = jax.block_until_ready(loss)

    ref = reference_loss(adj, emb, noise, params, users, items, neg_items)
    assert jnp.isfinite(loss), "non-finite loss"
    assert jnp.allclose(loss, ref, rtol=1e-3, atol=1e-3), (loss, ref)
    print("KERNEL_OK")
</pallas_src>

<mosaic_0001>
module attributes {stable_mosaic.version = 11 : i64} {
  func.func @vgae_fused_kernel(%arg0: i32, %arg1: memref<16x16xf32, #tpu.memory_space<vmem>>, %arg2: memref<16x128xf32, #tpu.memory_space<vmem>>, %arg3: memref<16x128xf32, #tpu.memory_space<vmem>>, %arg4: memref<2x16x1xi32, #tpu.memory_space<vmem>>, %arg5: memref<128x640xf32, #tpu.memory_space<vmem>>, %arg6: memref<8x256xf32, #tpu.memory_space<vmem>>, %arg7: memref<1x1xf32, #tpu.memory_space<vmem>>) attributes {dimension_semantics = [#tpu.dimension_semantics<arbitrary>], iteration_bounds = array<i64: 1>, scalar_prefetch = 0 : i64, scratch_operands = 0 : i64, tpu.core_type = #tpu.core_type<tc>, window_params = [{pipeline_mode = #tpu.pipeline_mode<synchronous>, transform_indices = @transform_0, window_bounds = array<i64: 16, 16>}, {pipeline_mode = #tpu.pipeline_mode<synchronous>, transform_indices = @transform_1, window_bounds = array<i64: 16, 128>}, {pipeline_mode = #tpu.pipeline_mode<synchronous>, transform_indices = @transform_2, window_bounds = array<i64: 16, 128>}, {pipeline_mode = #tpu.pipeline_mode<synchronous>, transform_indices = @transform_3, window_bounds = array<i64: 2, 16, 1>}, {pipeline_mode = #tpu.pipeline_mode<synchronous>, transform_indices = @transform_4, window_bounds = array<i64: 128, 640>}, {pipeline_mode = #tpu.pipeline_mode<synchronous>, transform_indices = @transform_5, window_bounds = array<i64: 8, 256>}, {pipeline_mode = #tpu.pipeline_mode<synchronous>, transform_indices = @transform_6, window_bounds = array<i64: 1, 1>}]} {
    %c0 = arith.constant 0 : index
    %c0_0 = arith.constant 0 : index
    %0 = vector.load %arg5[%c0, %c0_0] : memref<128x640xf32, #tpu.memory_space<vmem>>, vector<128x256xf32>
    %c0_1 = arith.constant 0 : index
    %c256 = arith.constant 256 : index
    %1 = vector.load %arg5[%c0_1, %c256] : memref<128x640xf32, #tpu.memory_space<vmem>>, vector<128x128xf32>
    %c0_2 = arith.constant 0 : index
    %c384 = arith.constant 384 : index
    %2 = vector.load %arg5[%c0_2, %c384] : memref<128x640xf32, #tpu.memory_space<vmem>>, vector<128x128xf32>
    %c0_3 = arith.constant 0 : index
    %c512 = arith.constant 512 : index
    %3 = vector.load %arg5[%c0_3, %c512] : memref<128x640xf32, #tpu.memory_space<vmem>>, vector<128x128xf32>
    %c0_4 = arith.constant 0 : index
    %c0_5 = arith.constant 0 : index
    %4 = vector.load %arg6[%c0_4, %c0_5] : memref<8x256xf32, #tpu.memory_space<vmem>>, vector<8x256xf32>
    %5 = vector.extract_strided_slice %4 {offsets = [0, 0], sizes = [1, 256], strides = [1, 1]} : vector<8x256xf32> to vector<1x256xf32>
    %6 = vector.extract_strided_slice %4 {offsets = [1, 0], sizes = [1, 128], strides = [1, 1]} : vector<8x256xf32> to vector<1x128xf32>
    %7 = vector.extract_strided_slice %4 {offsets = [1, 128], sizes = [1, 128], strides = [1, 1]} : vector<8x256xf32> to vector<1x128xf32>
    %8 = vector.extract_strided_slice %4 {offsets = [2, 0], sizes = [1, 128], strides = [1, 1]} : vector<8x256xf32> to vector<1x128xf32>
    %9 = vector.extract_strided_slice %4 {offsets = [2, 128], sizes = [1, 128], strides = [1, 1]} : vector<8x256xf32> to vector<1x128xf32>
    %10 = vector.extract_strided_slice %4 {offsets = [3, 0], sizes = [1, 1], strides = [1, 1]} : vector<8x256xf32> to vector<1x1xf32>
    %c0_6 = arith.constant 0 : index
    %c0_7 = arith.constant 0 : index
    %11 = vector.load %arg1[%c0_6, %c0_7] : memref<16x16xf32, #tpu.memory_space<vmem>>, vector<16x16xf32>
    %c0_8 = arith.constant 0 : index
    %c0_9 = arith.constant 0 : index
    %12 = vector.load %arg2[%c0_8, %c0_9] : memref<16x128xf32, #tpu.memory_space<vmem>>, vector<16x128xf32>
    %cst = arith.constant dense<0.000000e+00> : vector<16x128xf32>
    %13 = tpu.matmul %11, %12, %cst {dimension_numbers = #tpu.dot_dimension_numbers<[1], [0], [0], [1], [0, 0, 1, 1], [], []>} : vector<16x16xf32>, vector<16x128xf32>, vector<16x128xf32> -> vector<16x128xf32>
    %cst_10 = arith.constant dense<0.000000e+00> : vector<16x256xf32>
    %14 = tpu.matmul %13, %0, %cst_10 {dimension_numbers = #tpu.dot_dimension_numbers<[1], [0], [0], [1], [0, 0, 1, 1], [], []>} : vector<16x128xf32>, vector<128x256xf32>, vector<16x256xf32> -> vector<16x256xf32>
    %15 = vector.broadcast %5 : vector<1x256xf32> to vector<16x256xf32>
    %16 = arith.addf %14, %15 : vector<16x256xf32>
    %cst_11 = arith.constant 0.000000e+00 : f32
    %17 = vector.broadcast %cst_11 : f32 to vector<16x256xf32>
    %18 = arith.maximumf %16, %17 : vector<16x256xf32>
    %19 = vector.extract_strided_slice %18 {offsets = [0, 0], sizes = [16, 128], strides = [1, 1]} : vector<16x256xf32> to vector<16x128xf32>
    %cst_12 = arith.constant dense<0.000000e+00> : vector<16x128xf32>
    %20 = tpu.matmul %19, %1, %cst_12 {dimension_numbers = #tpu.dot_dimension_numbers<[1], [0], [0], [1], [0, 0, 1, 1], [], []>} : vector<16x128xf32>, vector<128x128xf32>, vector<16x128xf32> -> vector<16x128xf32>
    %21 = vector.broadcast %6 : vector<1x128xf32> to vector<16x128xf32>
    %22 = arith.addf %20, %21 : vector<16x128xf32>
    %23 = vector.extract_strided_slice %18 {offsets = [0, 128], sizes = [16, 128], strides = [1, 1]} : vector<16x256xf32> to vector<16x128xf32>
    %cst_13 = arith.constant dense<0.000000e+00> : vector<16x128xf32>
    %24 = tpu.matmul %23, %2, %cst_13 {dimension_numbers = #tpu.dot_dimension_numbers<[1], [0], [0], [1], [0, 0, 1, 1], [], []>} : vector<16x128xf32>, vector<128x128xf32>, vector<16x128xf32> -> vector<16x128xf32>
    %25 = vector.broadcast %7 : vector<1x128xf32> to vector<16x128xf32>
    %26 = arith.addf %24, %25 : vector<16x128xf32>
    %cst_14 = arith.constant 2.000000e+01 : f32
    %27 = vector.broadcast %cst_14 : f32 to vector<16x128xf32>
    %28 = arith.cmpf ogt, %26, %27 : vector<16x128xf32>
    %cst_15 = arith.constant 2.000000e+01 : f32
    %29 = vector.broadcast %cst_15 : f32 to vector<16x128xf32>
    %30 = arith.minimumf %26, %29 : vector<16x128xf32>
    %31 = math.exp %30 : vector<16x128xf32>
    %32 = math.log1p %31 : vector<16x128xf32>
    %33 = arith.select %28, %26, %32 : vector<16x128xi1>, vector<16x128xf32>
    %c0_16 = arith.constant 0 : index
    %c0_17 = arith.constant 0 : index
    %34 = vector.load %arg3[%c0_16, %c0_17] : memref<16x128xf32, #tpu.memory_space<vmem>>, vector<16x128xf32>
    %35 = arith.mulf %34, %33 : vector<16x128xf32>
    %36 = arith.addf %35, %22 : vector<16x128xf32>
    %37 = math.log %33 : vector<16x128xf32>
    %cst_18 = arith.constant 2.000000e+00 : f32
    %38 = vector.broadcast %cst_18 : f32 to vector<16x128xf32>
    %39 = arith.mulf %38, %37 : vector<16x128xf32>
    %cst_19 = arith.constant 1.000000e+00 : f32
    %40 = vector.broadcast %cst_19 : f32 to vector<16x128xf32>
    %41 = arith.addf %40, %39 : vector<16x128xf32>
    %42 = arith.mulf %22, %22 : vector<16x128xf32>
    %43 = arith.subf %41, %42 : vector<16x128xf32>
    %44 = arith.mulf %33, %33 : vector<16x128xf32>
    %45 = arith.subf %43, %44 : vector<16x128xf32>
    %cst_20 = arith.constant -5.000000e-01 : f32
    %46 = vector.broadcast %cst_20 : f32 to vector<16x128xf32>
    %47 = arith.mulf %46, %45 : vector<16x128xf32>
    %48 = vector.shape_cast %47 : vector<16x128xf32> to vector<1x16x128xf32>
    %cst_21 = arith.constant dense<0.000000e+00> : vector<1xf32>
    %49 = vector.multi_reduction <add>, %48, %cst_21 [1, 2] : vector<1x16x128xf32> to vector<1xf32>
    %50 = vector.shape_cast %49 : vector<1xf32> to vector<1x1x1xf32>
    %51 = vector.extract %50[0, 0, 0] : f32 from vector<1x1x1xf32>
    %52 = vector.broadcast %51 : f32 to vector<1x1xf32>
    %53 = tpu.iota {dimensions = array<i32: 1>} : vector<16x16xi32>
    %c0_22 = arith.constant 0 : index
    %c0_23 = arith.constant 0 : index
    %c0_24 = arith.constant 0 : index
    %54 = vector.load %arg4[%c0_22, %c0_23, %c0_24] : memref<2x16x1xi32, #tpu.memory_space<vmem>>, vector<1x16x1xi32>
    %55 = vector.shape_cast %54 : vector<1x16x1xi32> to vector<16x1xi32>
    %56 = vector.broadcast %55 : vector<16x1xi32> to vector<16x16xi32>
    %57 = arith.cmpi eq, %53, %56 : vector<16x16xi32>
    %58 = arith.extui %57 : vector<16x16xi1> to vector<16x16xi32>
    %59 = arith.sitofp %58 : vector<16x16xi32> to vector<16x16xf32>
    %c1 = arith.constant 1 : index
    %c0_25 = arith.constant 0 : index
    %c0_26 = arith.constant 0 : index
    %60 = vector.load %arg4[%c1, %c0_25, %c0_26] : memref<2x16x1xi32, #tpu.memory_space<vmem>>, vector<1x16x1xi32>
    %61 = vector.shape_cast %60 : vector<1x16x1xi32> to vector<16x1xi32>
    %62 = vector.broadcast %61 : vector<16x1xi32> to vector<16x16xi32>
    %63 = arith.cmpi eq, %53, %62 : vector<16x16xi32>
    %64 = arith.extui %63 : vector<16x16xi1> to vector<16x16xi32>
    %65 = arith.sitofp %64 : vector<16x16xi32> to vector<16x16xf32>
    %cst_27 = arith.constant dense<0.000000e+00> : vector<16x128xf32>
    %66 = tpu.matmul %59, %36, %cst_27 {dimension_numbers = #tpu.dot_dimension_numbers<[1], [0], [0], [1], [0, 0, 1, 1], [], []>} : vector<16x16xf32>, vector<16x128xf32>, vector<16x128xf32> -> vector<16x128xf32>
    %cst_28 = arith.constant dense<0.000000e+00> : vector<16x128xf32>
    %67 = tpu.matmul %65, %36, %cst_28 {dimension_numbers = #tpu.dot_dimension_numbers<[1], [0], [0], [1], [0, 0, 1, 1], [], []>} : vector<16x16xf32>, vector<16x128xf32>, vector<16x128xf32> -> vector<16x128xf32>
    %68 = arith.mulf %66, %67 : vector<16x128xf32>
    %cst_29 = arith.constant 0.000000e+00 : f32
    %69 = vector.broadcast %cst_29 : f32 to vector<16x128xf32>
    %70 = arith.maximumf %68, %69 : vector<16x128xf32>
    %cst_30 = arith.constant dense<0.000000e+00> : vector<16x128xf32>
    %71 = tpu.matmul %70, %3, %cst_30 {dimension_numbers = #tpu.dot_dimension_numbers<[1], [0], [0], [1], [0, 0, 1, 1], [], []>} : vector<16x128xf32>, vector<128x128xf32>, vector<16x128xf32> -> vector<16x128xf32>
    %72 = vector.broadcast %8 : vector<1x128xf32> to vector<16x128xf32>
    %73 = arith.addf %71, %72 : vector<16x128xf32>
    %cst_31 = arith.constant 0.000000e+00 : f32
    %74 = vector.broadcast %cst_31 : f32 to vector<16x128xf32>
    %75 = arith.maximumf %73, %74 : vector<16x128xf32>
    %76 = vector.broadcast %9 : vector<1x128xf32> to vector<16x128xf32>
    %77 = arith.mulf %75, %76 : vector<16x128xf32>
    %cst_32 = arith.constant dense<0.000000e+00> : vector<16xf32>
    %78 = vector.multi_reduction <add>, %77, %cst_32 [1] : vector<16x128xf32> to vector<16xf32>
    %79 = vector.shape_cast %78 : vector<16xf32> to vector<16x1xf32>
    %80 = vector.broadcast %10 : vector<1x1xf32> to vector<16x1xf32>
    %81 = arith.addf %79, %80 : vector<16x1xf32>
    %82 = tpu.iota {dimensions = array<i32: 0>} : vector<16x1xi32>
    %c8_i32 = arith.constant 8 : i32
    %83 = vector.broadcast %c8_i32 : i32 to vector<16x1xi32>
    %84 = arith.cmpi slt, %82, %83 : vector<16x1xi32>
    %cst_33 = arith.constant -1.000000e+00 : f32
    %cst_34 = arith.constant 1.000000e+00 : f32
    %85 = vector.broadcast %cst_33 : f32 to vector<16x1xf32>
    %86 = vector.broadcast %cst_34 : f32 to vector<16x1xf32>
    %87 = arith.select %84, %85, %86 : vector<16x1xi1>, vector<16x1xf32>
    %88 = arith.mulf %87, %81 : vector<16x1xf32>
    %cst_35 = arith.constant 0.000000e+00 : f32
    %89 = vector.broadcast %cst_35 : f32 to vector<16x1xf32>
    %90 = arith.maximumf %88, %89 : vector<16x1xf32>
    %91 = math.absf %88 : vector<16x1xf32>
    %cst_36 = arith.constant 0.000000e+00 : f32
    %92 = vector.broadcast %cst_36 : f32 to vector<16x1xf32>
    %93 = arith.subf %92, %91 : vector<16x1xf32>
    %94 = math.exp %93 : vector<16x1xf32>
    %95 = math.log1p %94 : vector<16x1xf32>
    %96 = arith.addf %90, %95 : vector<16x1xf32>
    %cst_37 = arith.constant 1.000000e+02 : f32
    %97 = vector.broadcast %cst_37 : f32 to vector<16x1xf32>
    %98 = arith.minimumf %96, %97 : vector<16x1xf32>
    %99 = vector.shape_cast %98 : vector<16x1xf32> to vector<1x16x1xf32>
    %cst_38 = arith.constant dense<0.000000e+00> : vector<1xf32>
    %100 = vector.multi_reduction <add>, %99, %cst_38 [1, 2] : vector<1x16x1xf32> to vector<1xf32>
    %101 = vector.shape_cast %100 : vector<1xf32> to vector<1x1x1xf32>
    %102 = vector.extract %101[0, 0, 0] : f32 from vector<1x1x1xf32>
    %103 = vector.broadcast %102 : f32 to vector<1x1xf32>
    %cst_39 = arith.constant 8.000000e+00 : f32
    %104 = vector.broadcast %cst_39 : f32 to vector<1x1xf32>
    %105 = arith.divf %103, %104 : vector<1x1xf32>
    %cst_40 = arith.constant 1.600000e+01 : f32
    %106 = vector.broadcast %cst_40 : f32 to vector<1x1xf32>
    %107 = arith.divf %52, %106 : vector<1x1xf32>
    %cst_41 = arith.constant 1.000000e-01 : f32
    %108 = vector.broadcast %cst_41 : f32 to vector<1x1xf32>
    %109 = arith.mulf %108, %107 : vector<1x1xf32>
    %110 = arith.addf %105, %109 : vector<1x1xf32>
    %c0_42 = arith.constant 0 : index
    %c0_43 = arith.constant 0 : index
    %111 = vector.load %arg7[%c0_42, %c0_43] : memref<1x1xf32, #tpu.memory_space<vmem>>, vector<1x1xf32>
    tpu.vector_store %arg7[%c0_42, %c0_43], %110 {strides = array<i32>} : memref<1x1xf32, #tpu.memory_space<vmem>>, vector<1x1xf32>,
    return
  }
  func.func @transform_0(%arg0: i32) -> (i32, i32) {
    %c0_i32 = arith.constant 0 : i32
    %c0_i32_0 = arith.constant 0 : i32
    %c0_i32_1 = arith.constant 0 : i32
    return %c0_i32, %c0_i32_0 : i32, i32
  }
  func.func @transform_1(%arg0: i32) -> (i32, i32) {
    %c0_i32 = arith.constant 0 : i32
    %c0_i32_0 = arith.constant 0 : i32
    %c0_i32_1 = arith.constant 0 : i32
    return %c0_i32, %c0_i32_0 : i32, i32
  }
  func.func @transform_2(%arg0: i32) -> (i32, i32) {
    %c0_i32 = arith.constant 0 : i32
    %c0_i32_0 = arith.constant 0 : i32
    %c0_i32_1 = arith.constant 0 : i32
    return %c0_i32, %c0_i32_0 : i32, i32
  }
  func.func @transform_3(%arg0: i32) -> (i32, i32, i32) {
    %c0_i32 = arith.constant 0 : i32
    %c0_i32_0 = arith.constant 0 : i32
    %c0_i32_1 = arith.constant 0 : i32
    %c0_i32_2 = arith.constant 0 : i32
    return %c0_i32, %c0_i32_0, %c0_i32_1 : i32, i32, i32
  }
  func.func @transform_4(%arg0: i32) -> (i32, i32) {
    %c0_i32 = arith.constant 0 : i32
    %c0_i32_0 = arith.constant 0 : i32
    %c0_i32_1 = arith.constant 0 : i32
    return %c0_i32, %c0_i32_0 : i32, i32
  }
  func.func @transform_5(%arg0: i32) -> (i32, i32) {
    %c0_i32 = arith.constant 0 : i32
    %c0_i32_0 = arith.constant 0 : i32
    %c0_i32_1 = arith.constant 0 : i32
    return %c0_i32, %c0_i32_0 : i32, i32
  }
  func.func @transform_6(%arg0: i32) -> (i32, i32) {
    %c0_i32 = arith.constant 0 : i32
    %c0_i32_0 = arith.constant 0 : i32
    %c0_i32_1 = arith.constant 0 : i32
    return %c0_i32, %c0_i32_0 : i32, i32
  }
}

</mosaic_0001>

<bundles_post_ra>
// kernel: tpu_custom_call.1
= control target key start
LH: loop header
LB: loop body
LE: loop exit
PB: predicated region body
PF: predicated region fallthrough
CT: control target
= control target key end

     0   :  { %11 = vsyncpa [#allocation3], 0  ;;  %s1356_s0 = inlined_call_operand.vmem [shape: f32[16,16], index: 0, kind: input, shape index: {}]   ;;  %s1357_s1 = inlined_call_operand.vmem [shape: f32[16,128], index: 1, kind: input, shape index: {}]   ;;  %s1358_s2 = inlined_call_operand.hbm [shape: f32[16,128], index: 2, kind: input, shape index: {}]   ;;  %s1359_s3 = inlined_call_operand.vmem [shape: s32[2,16,1], index: 3, kind: input, shape index: {}]   ;;  %s1360_s4 = inlined_call_operand.hbm [shape: f32[128,640], index: 4, kind: input, shape index: {}]   ;;  %s1361_s5 = inlined_call_operand.hbm [shape: f32[8,256], index: 5, kind: input, shape index: {}]   ;;  %s1362_s6 = inlined_call_operand.hbm [shape: f32[1,1], index: 6, kind: output, shape index: {}]  }
   0x1   :  { %12 = vsyncpa [#allocation6], 0 }
   0x2   :  { %13 = vsyncpa [#allocation4], 0  ;;  %s1240_s21 = smov [#allocation5]  }
   0x3   :  { %s37_s22 = sshll.u32 %s1240_s21, 4  ;;  %s38_s22 = int_to_ptr.vmem [resolvable:$true] %s37_s22 }
   0x4   :  { %s1162_s23 = scalar_lea.vmem %s38_s22, 10240  ;;  %p1167_p1 = scmp.lt.s32.totalorder %s38_s22, %s38_s22 }
   0x5   :  { %p1163_p0 = scmp.ne.s32.totalorder %s38_s22, %s1162_s23  ;;  %p1168_p2 = scmp.lt.s32.totalorder %s1162_s23, %s1162_s23 }
   0x7   :  { %p1169_p3 = por %p1168_p2, %p1167_p1 }
   0x9   :  { %p1170_p4 = pnand %p1169_p3, %p1163_p0 }
   0xb   :  { %1173 = shalt.err (!%p1170_p4)
}
   0xc   :  { %s1241_s24 = smov 640   ;;  %s1242_s25 = smov 40  }
   0xd   :  { %43 = dma.hbm_to_vmem [thread:$0]  %s1360_s4, 10240, %s38_s22, [#allocation6], %s1241_s24, %s1241_s24, %s1242_s25  }
   0xe   :  { %s1243_s28 = smov [#allocation2]  }
   0xf   :  { %s23_s29 = sshll.u32 %s1243_s28, 4  ;;  %s24_s29 = int_to_ptr.vmem [resolvable:$true] %s23_s29 }
  0x10   :  { %s1182_s30 = scalar_lea.vmem %s24_s29, 256  ;;  %p1187_p6 = scmp.lt.s32.totalorder %s24_s29, %s24_s29 }
  0x11   :  { %p1183_p5 = scmp.ne.s32.totalorder %s24_s29, %s1182_s30  ;;  %p1188_p7 = scmp.lt.s32.totalorder %s1182_s30, %s1182_s30 }
  0x13   :  { %p1189_p8 = por %p1188_p7, %p1187_p6 }
  0x15   :  { %p1190_p9 = pnand %p1189_p8, %p1183_p5 }
  0x17   :  { %1193 = shalt.err (!%p1190_p9)
}
  0x18   :  { %s1244_s7 = smov 128   ;;  %s1245_s8 = smov 8  }
  0x19   :  { %29 = dma.hbm_to_vmem [thread:$0]  %s1358_s2, 256, %s24_s29, [#allocation3], %s1244_s7, %s1244_s7, %s1245_s8  }
  0x1a   :  { %s1246_s11 = smov [#allocation7]  }
  0x1b   :  { %s50_s12 = sshll.u32 %s1246_s11, 4  ;;  %s51_s12 = int_to_ptr.vmem [resolvable:$true] %s50_s12 }
  0x1c   :  { %s1202_s4 = scalar_lea.vmem %s51_s12, 256  ;;  %p1207_p11 = scmp.lt.s32.totalorder %s51_s12, %s51_s12 }
  0x1d   :  { %p1203_p10 = scmp.ne.s32.totalorder %s51_s12, %s1202_s4  ;;  %p1208_p12 = scmp.lt.s32.totalorder %s1202_s4, %s1202_s4 }
  0x1f   :  { %p1209_p13 = por %p1208_p12, %p1207_p11 }
  0x21   :  { %p1210_p0 = pnand %p1209_p13, %p1203_p10 }
  0x23   :  { %1213 = shalt.err (!%p1210_p0)
}
  0x24   :  { %53 = dma.hbm_to_vmem [thread:$0]  %s1361_s5, 256, %s51_s12, [#allocation6]  }
  0x25   :  { %1234 = dma.done.wait [#allocation3], 256  }
  0x26   :  { %1235 = vsyncadd [#allocation3], 4294967040 }
  0x27   :  { %1236 = dma.done.wait [#allocation6], 10496  }
  0x28   :  { %1237 = vsyncadd [#allocation6], 4294956800  ;;  %vm149_vm0 = vcmask 130048   ;;  %v148_v0 = vld [vmem:[%s1357_s1 + $0x8] sm:$0xff]  ;;  %v147_v1 = vld [vmem:[%s1357_s1] sm:$0xff]  ;;  %v1247_v36 = vmov 0.0  }
  0x29   :  { %v145_v2 = vld [vmem:[%s1356_s0] sm:$0xff]  ;;  %992 = vmatprep.subr.mxu1 %v148_v0  ;;  %v146_v3 = vld [vmem:[%s1356_s0 + $0x8] sm:$0xff]  ;;  %v94_v4 = vld [vmem:[#allocation5 + $0x260] sm:$0xff]  ;;  %vm876_vm11 = vcmask 7168   ;;  %s1249_s28 = smov [#allocation8]   ;;  %vm896_vm12 = vcmask 0  }
  0x2a   :  { %996 = vmatprep.mubr.msk.f32.mxu1 %vm149_vm0, %v145_v2  ;;  %993 = vmatpush3.msra.mxu1 %v148_v0  ;;  %v93_v5 = vld [vmem:[#allocation5 + $0x258] sm:$0xff]  ;;  %v91_v7 = vld [vmem:[#allocation5 + $0x230] sm:$0xff]  ;;  %v89_v9 = vld [vmem:[#allocation5 + $0x208] sm:$0xff]  ;;  %s904_s29 = sshll.u32 %s1249_s28, 4  ;;  %s905_s29 = int_to_ptr.vmem [resolvable:$true] %s904_s29 }
  0x2b   :  { %994 = vmatprep.subr.mxu1 %v147_v1  ;;  %v92_v6 = vld [vmem:[#allocation5 + $0x238] sm:$0xff]  ;;  %v90_v8 = vld [vmem:[#allocation5 + $0x210] sm:$0xff]  ;;  %v88_v10 = vld [vmem:[#allocation5 + $0x1e8] sm:$0xff]  ;;  %s1214_s30 = scalar_lea.vmem %s905_s29, 16  ;;  %s1218_s7 = scalar_lea.vmem %s905_s29, 32 }
  0x2c   :  { %995 = vmatpush3.msra.mxu1 %v147_v1  ;;  %v87_v11 = vld [vmem:[#allocation5 + $0x1e0] sm:$0xff]  ;;  %v85_v13 = vld [vmem:[#allocation5 + $0x1b8] sm:$0xff]  ;;  %v83_v15 = vld [vmem:[#allocation5 + $0x190] sm:$0xff]  ;;  %p1215_p1 = scmp.ne.s32.totalorder %s905_s29, %s1214_s30  ;;  %p1219_p2 = scmp.lt.s32.totalorder %s905_s29, %s905_s29 }
  0x2d   :  { %997 = vmatmul.mubr.msk.f32.vlgmr.msra.gmra.mxu1 %vm149_vm0, %v146_v3  ;;  %239 = vmatprep.subr.mxu1 %v94_v4  ;;  %v86_v12 = vld [vmem:[#allocation5 + $0x1c0] sm:$0xff]  ;;  %v84_v14 = vld [vmem:[#allocation5 + $0x198] sm:$0xff]  ;;  %v82_v16 = vld [vmem:[#allocation5 + $0x170] sm:$0xff]  ;;  %p1220_p3 = scmp.lt.s32.totalorder %s1218_s7, %s1214_s30 }
  0x2e   :  { %240 = vmatpush1.msra.mxu1 %v93_v5  ;;  %v81_v17 = vld [vmem:[#allocation5 + $0x168] sm:$0xff]  ;;  %v79_v19 = vld [vmem:[#allocation5 + $0x140] sm:$0xff]  ;;  %v77_v21 = vld [vmem:[#allocation5 + $0x118] sm:$0xff]  ;;  %303 = vmatprep.mubr.f32.mxu1 %v1247_v36 }
  0x2f   :  { %241 = vmatprep.subr.mxu1 %v92_v6  ;;  %v80_v18 = vld [vmem:[#allocation5 + $0x148] sm:$0xff]  ;;  %v78_v20 = vld [vmem:[#allocation5 + $0x120] sm:$0xff]  ;;  %v76_v22 = vld [vmem:[#allocation5 + $0xf8] sm:$0xff]  ;;  %p1221_p4 = por %p1220_p3, %p1219_p2 }
  0x30   :  { %242 = vmatpush1.msra.mxu1 %v91_v7  ;;  %v75_v23 = vld [vmem:[#allocation5 + $0xf0] sm:$0xff]  ;;  %v73_v25 = vld [vmem:[#allocation5 + $0xc8] sm:$0xff]  ;;  %v71_v27 = vld [vmem:[#allocation5 + $0xa0] sm:$0xff] }
  0x31   :  { %243 = vmatprep.subr.mxu1 %v90_v8  ;;  %v74_v24 = vld [vmem:[#allocation5 + $0xd0] sm:$0xff]  ;;  %v72_v26 = vld [vmem:[#allocation5 + $0xa8] sm:$0xff]  ;;  %v70_v28 = vld [vmem:[#allocation5 + $0x80] sm:$0xff]  ;;  %p1222_p5 = pnand %p1221_p4, %p1215_p1 }
  0x32   :  { %244 = vmatpush1.msra.mxu1 %v89_v9  ;;  %v69_v29 = vld [vmem:[#allocation5 + $0x78] sm:$0xff]  ;;  %v67_v31 = vld [vmem:[#allocation5 + $0x50] sm:$0xff]  ;;  %v65_v33 = vld [vmem:[#allocation5 + $0x28] sm:$0xff]  ;;  %v1248_v9 = vmov 0  }
  0x33   :  { %245 = vmatprep.subr.mxu1 %v88_v10  ;;  %v68_v30 = vld [vmem:[#allocation5 + $0x58] sm:$0xff]  ;;  %v66_v32 = vld [vmem:[#allocation5 + $0x30] sm:$0xff]  ;;  %v64_v34 = vld [vmem:[#allocation5 + $0x8] sm:$0xff]  ;;  %1132 = vset.pattern.permute.xlu0 %v1248_v9 }
  0x34   :  { %246 = vmatpush1.msra.mxu1 %v87_v11  ;;  %v63_v35 = vld [vmem:[#allocation5] sm:$0xff]  ;;  %v110_v37 = vld [vmem:[#allocation5 + $0x268] sm:$0xff]  ;;  %v126_v39 = vld [vmem:[#allocation5 + $0x270] sm:$0xff]  ;;  %1133 = vset.pattern.permute.xlu1 %v1248_v9 }
  0x35   :  { %247 = vmatprep.subr.mxu1 %v86_v12  ;;  %v109_v38 = vld [vmem:[#allocation5 + $0x240] sm:$0xff]  ;;  %999 = vmatprep.subr.mxu0 %v110_v37  ;;  %v108_v40 = vld [vmem:[#allocation5 + $0x218] sm:$0xff]  ;;  %v107_v41 = vld [vmem:[#allocation5 + $0x1f0] sm:$0xff]  ;;  %v231_v12 = vlaneseq }
  0x36   :  { %248 = vmatpush1.msra.mxu1 %v85_v13  ;;  %1000 = vmatpush3.msra.mxu0 %v110_v37  ;;  %v106_v42 = vld [vmem:[#allocation5 + $0x1c8] sm:$0xff]  ;;  %v105_v43 = vld [vmem:[#allocation5 + $0x1a0] sm:$0xff]  ;;  %v104_v44 = vld [vmem:[#allocation5 + $0x178] sm:$0xff] }
  0x37   :  { %249 = vmatprep.subr.mxu1 %v84_v14  ;;  %1001 = vmatprep.subr.mxu0 %v109_v38  ;;  %v103_v45 = vld [vmem:[#allocation5 + $0x150] sm:$0xff]  ;;  %v102_v46 = vld [vmem:[#allocation5 + $0x128] sm:$0xff]  ;;  %v101_v47 = vld [vmem:[#allocation5 + $0x100] sm:$0xff]  ;;  %v1322_v13 = vshrl.u32 %v231_v12, 7 }
  0x38   :  { %250 = vmatpush1.msra.mxu1 %v83_v15  ;;  %1002 = vmatpush3.msra.mxu0 %v109_v38  ;;  %v100_v48 = vld [vmem:[#allocation5 + $0xd8] sm:$0xff]  ;;  %v99_v49 = vld [vmem:[#allocation5 + $0xb0] sm:$0xff]  ;;  %v125_v52 = vld [vmem:[#allocation5 + $0x248] sm:$0xff] }
  0x39   :  { %251 = vmatprep.subr.mxu1 %v82_v16  ;;  %1003 = vmatprep.subr.mxu0 %v108_v40  ;;  %v124_v53 = vld [vmem:[#allocation5 + $0x220] sm:$0xff]  ;;  %v123_v54 = vld [vmem:[#allocation5 + $0x1f8] sm:$0xff]  ;;  %v122_v55 = vld [vmem:[#allocation5 + $0x1d0] sm:$0xff]  ;;  %v233_v14 = vsub.s32 0, %v1322_v13 }
  0x3a   :  { %252 = vmatpush1.msra.mxu1 %v81_v17  ;;  %1004 = vmatpush3.msra.mxu0 %v108_v40  ;;  %v121_v56 = vld [vmem:[#allocation5 + $0x1a8] sm:$0xff]  ;;  %v120_v57 = vld [vmem:[#allocation5 + $0x180] sm:$0xff]  ;;  %v119_v58 = vld [vmem:[#allocation5 + $0x158] sm:$0xff] }
  0x3b   :  { %253 = vmatprep.subr.mxu1 %v80_v18  ;;  %1005 = vmatprep.subr.mxu0 %v107_v41  ;;  %v118_v59 = vld [vmem:[#allocation5 + $0x130] sm:$0xff]  ;;  %v117_v60 = vld [vmem:[#allocation5 + $0x108] sm:$0xff]  ;;  %v116_v61 = vld [vmem:[#allocation5 + $0xe0] sm:$0xff] }
  0x3c   :  { %254 = vmatpush1.msra.mxu1 %v79_v19  ;;  %1006 = vmatpush3.msra.mxu0 %v107_v41  ;;  %v98_v62 = vld [vmem:[#allocation5 + $0x88] sm:$0xff]  ;;  %v115_v63 = vld [vmem:[#allocation5 + $0xb8] sm:$0xff]  ;;  %v97_v0 = vld [vmem:[#allocation5 + $0x60] sm:$0xff] }
  0x3d   :  { %255 = vmatprep.subr.mxu1 %v78_v20  ;;  %1007 = vmatprep.subr.mxu0 %v106_v42  ;;  %v114_v1 = vld [vmem:[#allocation5 + $0x90] sm:$0xff]  ;;  %v96_v2 = vld [vmem:[#allocation5 + $0x38] sm:$0xff]  ;;  %v113_v3 = vld [vmem:[#allocation5 + $0x68] sm:$0xff] }
  0x3e   :  { %256 = vmatpush1.msra.mxu1 %v77_v21  ;;  %1008 = vmatpush3.msra.mxu0 %v106_v42  ;;  %v95_v4 = vld [vmem:[#allocation5 + $0x10] sm:$0xff]  ;;  %v112_v5 = vld [vmem:[#allocation5 + $0x40] sm:$0xff]  ;;  %v111_v6 = vld [vmem:[#allocation5 + $0x18] sm:$0xff] }
  0x3f   :  { %257 = vmatprep.subr.mxu1 %v76_v22  ;;  %1009 = vmatprep.subr.mxu0 %v105_v43  ;;  %v543_v7 = vld [vmem:[%s1359_s3] sm:$0xff]  ;;  %v918_v8 = vld [vmem:[%s1359_s3 + $0x10] sm:$0xff]  ;;  %v544_v10 = vld [vmem:[%s1359_s3 + $0x8] sm:$0xff] }
  0x40   :  { %258 = vmatpush1.msra.mxu1 %v75_v23  ;;  %1010 = vmatpush3.msra.mxu0 %v105_v43  ;;  %v919_v11 = vld [vmem:[%s1359_s3 + $0x18] sm:$0xff]  ;;  %v1325_v15 = vld [vmem:[#allocation7] sm:$0xff] }
  0x41   :  { %259 = vmatprep.subr.mxu1 %v74_v24  ;;  %1011 = vmatprep.subr.mxu0 %v104_v44  ;;  %v1327_v16 = vld [vmem:[#allocation7 + $0x8] sm:$0xff]  ;;  %v234_v17 = vrot.slane %v1325_v15, %v233_v14 }
  0x42   :  { %260 = vmatpush1.msra.mxu1 %v73_v25  ;;  %1012 = vmatpush3.msra.mxu0 %v104_v44  ;;  %v238_v18 = vrot.slane %v1327_v16, %v233_v14 }
  0x43   :  { %261 = vmatprep.subr.mxu1 %v72_v26  ;;  %1013 = vmatprep.subr.mxu0 %v103_v45 }
  0x44   :  { %262 = vmatpush1.msra.mxu1 %v71_v27  ;;  %1014 = vmatpush3.msra.mxu0 %v103_v45 }
  0x45   :  { %263 = vmatprep.subr.mxu1 %v70_v28  ;;  %1015 = vmatprep.subr.mxu0 %v102_v46 }
  0x46   :  { %264 = vmatpush1.msra.mxu1 %v69_v29  ;;  %1016 = vmatpush3.msra.mxu0 %v102_v46 }
  0x47   :  { %265 = vmatprep.subr.mxu1 %v68_v30  ;;  %1017 = vmatprep.subr.mxu0 %v101_v47 }
  0x48   :  { %266 = vmatpush1.msra.mxu1 %v67_v31  ;;  %1018 = vmatpush3.msra.mxu0 %v101_v47  ;;  %v1331_v31 = vand.u32 127, %v231_v12 }
  0x49   :  { %267 = vmatprep.subr.mxu1 %v66_v32  ;;  %1019 = vmatprep.subr.mxu0 %v100_v48 }
  0x4a   :  { %268 = vmatpush1.msra.mxu1 %v65_v33  ;;  %1020 = vmatpush3.msra.mxu0 %v100_v48 }
  0x4b   :  { %269 = vmatprep.subr.mxu1 %v64_v34  ;;  %1021 = vmatprep.subr.mxu0 %v99_v49  ;;  %v322_v34 = vsub.s32 1, %v1322_v13 }
  0x4c   :  { %270 = vmatpush1.msra.mxu1 %v63_v35  ;;  %1022 = vmatpush3.msra.mxu0 %v99_v49 }
  0x4d   :  { %1034 = vmatprep.subr.mxu1 %v126_v39  ;;  %1023 = vmatprep.subr.mxu0 %v98_v62  ;;  %v402_v35 = vrot.slane %v1327_v16, %v322_v34 }
  0x4e   :  { %1024 = vmatpush3.msra.mxu0 %v98_v62  ;;  %546 = vperm.xlu0 %1132, %v543_v7  }
  0x4f   :  { %1025 = vmatprep.subr.mxu0 %v97_v0  ;;  %561 = vperm.xlu1 %1133, %v918_v8  }
  0x50   :  { %1026 = vmatpush3.msra.mxu0 %v97_v0 }
  0x51   :  { %1027 = vmatprep.subr.mxu0 %v96_v2 }
  0x52   :  { %1028 = vmatpush3.msra.mxu0 %v96_v2  ;;  %549 = vperm.xlu0 %1132, %v544_v10  }
  0x53   :  { %1029 = vmatprep.subr.mxu0 %v95_v4  ;;  %564 = vperm.xlu1 %1133, %v919_v11  }
  0x54   :  { %1030 = vmatpush3.msra.mxu0 %v95_v4  ;;  %v506_v4 = vld [vmem:[#allocation2] sm:$0xff] }
  0xc9   :  { %v547_v32 = vpop.permute.xlu0 %546 }
  0xca   :  { %vm551_vm1 = vcmp.eq.s32.totalorder %v1331_v31, %v547_v32 }
  0xcb   :  { %v916_v33 = vsel %vm551_vm1, 1.0, %v1247_v36 }
  0xcd   :  { %v550_v9 = vpop.permute.xlu0 %549 }
  0xce   :  { %vm552_vm7 = vcmp.eq.s32.totalorder %v1331_v31, %v550_v9 }
  0xed   :  { %v998_v50 = vpop.f32.mrf.mxu1 }
  0xef   :  { %v222_v51 = vpop.f32.mrf.mxu1 }
  0xf0   :  { %304 = vmatmul.mubr.f32.vlgmr.msra.gmra.mxu1 %v222_v51 }
  0xf1   :  { %309 = vmatprep.mubr.f32.mxu1 %v1247_v36  ;;  %1035 = vmatpush3.msra.mxu1 %v126_v39 }
  0xf2   :  { %1036 = vmatprep.subr.mxu1 %v125_v52 }
  0xf3   :  { %1037 = vmatpush3.msra.mxu1 %v125_v52 }
  0xf4   :  { %310 = vmatmul.mubr.f32.gmra.mxu1 %v998_v50  ;;  %1038 = vmatprep.subr.mxu1 %v124_v53 }
  0xf5   :  { %1039 = vmatpush3.msra.mxu1 %v124_v53 }
  0xf6   :  { %1040 = vmatprep.subr.mxu1 %v123_v54 }
  0xf7   :  { %1041 = vmatpush3.msra.mxu1 %v123_v54 }
  0xf8   :  { %1042 = vmatprep.subr.mxu1 %v122_v55 }
  0xf9   :  { %1043 = vmatpush3.msra.mxu1 %v122_v55  ;;  %v323_v55 = vrot.slane %v1325_v15, %v322_v34 }
  0xfa   :  { %1044 = vmatprep.subr.mxu1 %v121_v56 }
  0xfb   :  { %1045 = vmatpush3.msra.mxu1 %v121_v56 }
  0xfc   :  { %1046 = vmatprep.subr.mxu1 %v120_v57 }
  0xfd   :  { %1047 = vmatpush3.msra.mxu1 %v120_v57 }
  0xfe   :  { %1048 = vmatprep.subr.mxu1 %v119_v58 }
  0xff   :  { %1049 = vmatpush3.msra.mxu1 %v119_v58 }
 0x100   :  { %1050 = vmatprep.subr.mxu1 %v118_v59 }
 0x101   :  { %1051 = vmatpush3.msra.mxu1 %v118_v59 }
 0x102   :  { %1052 = vmatprep.subr.mxu1 %v117_v60 }
 0x103   :  { %1053 = vmatpush3.msra.mxu1 %v117_v60 }
 0x104   :  { %1054 = vmatprep.subr.mxu1 %v116_v61 }
 0x105   :  { %1055 = vmatpush3.msra.mxu1 %v116_v61  ;;  %v507_v61 = vld [vmem:[#allocation2 + $0x8] sm:$0xff] }
 0x106   :  { %1056 = vmatprep.subr.mxu1 %v115_v63 }
 0x107   :  { %1057 = vmatpush3.msra.mxu1 %v115_v63 }
 0x108   :  { %1058 = vmatprep.subr.mxu1 %v114_v1 }
 0x109   :  { %1059 = vmatpush3.msra.mxu1 %v114_v1 }
 0x10a   :  { %1060 = vmatprep.subr.mxu1 %v113_v3 }
 0x10b   :  { %1061 = vmatpush3.msra.mxu1 %v113_v3 }
 0x10c   :  { %1062 = vmatprep.subr.mxu1 %v112_v5 }
 0x10d   :  { %1063 = vmatpush3.msra.mxu1 %v112_v5  ;;  %v562_v5 = vpop.permute.xlu1 %561 }
 0x10e   :  { %1064 = vmatprep.subr.mxu1 %v111_v6  ;;  %vm566_vm6 = vcmp.eq.s32.totalorder %v1331_v31, %v562_v5 }
 0x10f   :  { %1065 = vmatpush3.msra.mxu1 %v111_v6 }
 0x1b0   :  { %v305_v19 = vpop.f32.mrf.mxu1 }
 0x1b1   :  { %v306_v20 = vadd.f32 %v305_v19, %v234_v17  ;;  %v917_v19 = vsel %vm552_vm7, 1.0, %v1247_v36 }
 0x1b2   :  { %v307_v21 = vpop.f32.mrf.mxu1 }
 0x1b3   :  { %v308_v22 = vadd.f32 %v307_v21, %v238_v18  ;;  %v316_v23 = vmax.f32 %v306_v20, 0.0  ;;  %v142_v20 = vld [vmem:[#allocation5 + $0x278] sm:$0xff] }
 0x1b4   :  { %v311_v24 = vpop.f32.mrf.mxu1 }
 0x1b5   :  { %v317_v25 = vmax.f32 %v308_v22, 0.0  ;;  %v312_v26 = vadd.f32 %v311_v24, %v234_v17  ;;  %1031 = vmatprep.mubr.f32.mxu0 %v316_v23  ;;  %v565_v17 = vpop.permute.xlu1 %564  ;;  %v141_v22 = vld [vmem:[#allocation5 + $0x250] sm:$0xff]  ;;  %v140_v24 = vld [vmem:[#allocation5 + $0x228] sm:$0xff] }
 0x1b6   :  { %v313_v27 = vpop.f32.mrf.mxu1  ;;  %vm567_vm8 = vcmp.eq.s32.totalorder %v1331_v31, %v565_v17 }
 0x1b7   :  { %v318_v28 = vmax.f32 %v312_v26, 0.0  ;;  %v314_v29 = vadd.f32 %v313_v27, %v238_v18  ;;  %1066 = vmatprep.mubr.f32.mxu1 %v317_v25  ;;  %v920_v18 = vsel %vm566_vm6, 1.0, %v1247_v36  ;;  %v921_v21 = vsel %vm567_vm8, 1.0, %v1247_v36  ;;  %v139_v27 = vld [vmem:[#allocation5 + $0x200] sm:$0xff] }
 0x1b9   :  { %v319_v30 = vmax.f32 %v314_v29, 0.0  ;;  %1032 = vmatmul.mubr.f32.vlgmr.msra.gmra.mxu0 %v318_v28 }
 0x1ba   :  { %1073 = vmatprep.mubr.msk.f32.mxu0 %vm149_vm0, %v916_v33  ;;  %v137_v33 = vld [vmem:[#allocation5 + $0x1b0] sm:$0xff] }
 0x1bb   :  { %1067 = vmatmul.mubr.f32.vlgmr.msra.gmra.mxu1 %v319_v30  ;;  %v138_v30 = vld [vmem:[#allocation5 + $0x1d8] sm:$0xff] }
 0x279   :  { %v1033_v56 = vpop.f32.mrf.mxu0 }
 0x27a   :  { %v396_v1 = vadd.f32 %v1033_v56, %v323_v55 }
 0x27b   :  { %v1068_v37 = vpop.f32.mrf.mxu1  ;;  %v390_v2 = vpop.f32.mrf.mxu0 }
 0x27c   :  { %v475_v38 = vadd.f32 %v1068_v37, %v402_v35  ;;  %v391_v10 = vadd.f32 %v390_v2, %v323_v55  ;;  %v521_v31 = vmul.f32 %v396_v1, %v396_v1  ;;  %v127_v55 = vld [vmem:[#allocation5 + $0x20] sm:$0xff] }
 0x27d   :  { %v469_v39 = vpop.f32.mrf.mxu1 }
 0x27e   :  { %v481_v40 = vmin.f32 %v475_v38, 20.0  ;;  %v470_v41 = vadd.f32 %v469_v39, %v402_v35  ;;  %vm479_vm3 = vcmp.gt.f32.partialorder %v475_v38, 20.0  ;;  %v520_v34 = vmul.f32 %v391_v10, %v391_v10  ;;  %v136_v39 = vld [vmem:[#allocation5 + $0x188] sm:$0xff] }
 0x280   :  { %v484_v42 = vmul.f32 1.442695, %v481_v40  ;;  %v480_v43 = vmin.f32 %v470_v41, 20.0  ;;  %vm478_vm5 = vcmp.gt.f32.partialorder %v470_v41, 20.0 }
 0x282   :  { %1134 = vpow2.f32 %v484_v42  ;;  %v482_v44 = vmul.f32 1.442695, %v480_v43  ;;  %v135_v43 = vld [vmem:[#allocation5 + $0x160] sm:$0xff] }
 0x284   :  { %1136 = vpow2.f32 %v482_v44 }
 0x28f   :  { %v1135_v45 = vpop.eup %1134 }
 0x290   :  { %v495_v46 = vadd.f32 1.0, %v1135_v45  ;;  %v498_v49 = vmul.f32 -0.5, %v1135_v45  ;;  %v501_v52 = vand.u32 2147483647, %v1135_v45 }
 0x291   :  { %v1137_v47 = vpop.eup %1136 }
 0x292   :  { %1138 = vlog2.f32 %v495_v46  ;;  %v486_v48 = vadd.f32 1.0, %v1137_v47  ;;  %v489_v50 = vmul.f32 -0.5, %v1137_v47  ;;  %v499_v51 = vadd.f32 1.0, %v498_v49 }
 0x293   :  { %v492_v57 = vand.u32 2147483647, %v1137_v47  ;;  %vm502_vm2 = vcmp.lt.f32.partialorder %v501_v52, 0.0004427343  ;;  %v130_v52 = vld [vmem:[#allocation5 + $0x98] sm:$0xff] }
 0x294   :  { %1140 = vlog2.f32 %v486_v48  ;;  %v490_v53 = vadd.f32 1.0, %v489_v50  ;;  %v500_v59 = vmul.f32 %v1135_v45, %v499_v51  ;;  %v134_v45 = vld [vmem:[#allocation5 + $0x138] sm:$0xff]  ;;  %v133_v48 = vld [vmem:[#allocation5 + $0x110] sm:$0xff]  ;;  %v132_v50 = vld [vmem:[#allocation5 + $0xe8] sm:$0xff] }
 0x295   :  { %vm493_vm4 = vcmp.lt.f32.partialorder %v492_v57, 0.0004427343  ;;  %v131_v51 = vld [vmem:[#allocation5 + $0xc0] sm:$0xff] }
 0x296   :  { %v491_v0 = vmul.f32 %v1137_v47, %v490_v53  ;;  %v129_v53 = vld [vmem:[#allocation5 + $0x70] sm:$0xff] }
 0x29f   :  { %v1139_v54 = vpop.eup %1138 }
 0x2a0   :  { %v497_v58 = vmul.f32 0.6931472, %v1139_v54  ;;  %v128_v54 = vld [vmem:[#allocation5 + $0x48] sm:$0xff] }
 0x2a1   :  { %v1141_v60 = vpop.eup %1140 }
 0x2a2   :  { %v503_v62 = vsel %vm502_vm2, %v500_v59, %v497_v58  ;;  %v488_v63 = vmul.f32 0.6931472, %v1141_v60 }
 0x2a3   :  { %v505_v3 = vsel %vm479_vm3, %v475_v38, %v503_v62 }
 0x2a4   :  { %v509_v6 = vmul.f32 %v507_v61, %v505_v3  ;;  %1142 = vlog2.f32 %v505_v3  ;;  %v494_v7 = vsel %vm493_vm4, %v491_v0, %v488_v63  ;;  %v525_v38 = vmul.f32 %v505_v3, %v505_v3 }
 0x2a5   :  { %v504_v8 = vsel %vm478_vm5, %v470_v41, %v494_v7  ;;  %v740_v0 = vsub.s32 2, %v1322_v13 }
 0x2a6   :  { %v508_v11 = vmul.f32 %v506_v4, %v504_v8  ;;  %1144 = vlog2.f32 %v504_v8  ;;  %v511_v12 = vadd.f32 %v509_v6, %v396_v1  ;;  %v524_v41 = vmul.f32 %v504_v8, %v504_v8 }
 0x2a7   :  { %v741_v1 = vrot.slane %v1325_v15, %v740_v0  ;;  %v822_v4 = vrot.slane %v1327_v16, %v740_v0 }
 0x2a8   :  { %1069 = vmatprep.subr.mxu0 %v511_v12  ;;  %v510_v14 = vadd.f32 %v508_v11, %v391_v10  ;;  %v831_v11 = vsub.s32 3, %v1322_v13 }
 0x2a9   :  { %1070 = vmatpush3.msra.mxu0 %v511_v12 }
 0x2aa   :  { %1071 = vmatprep.subr.mxu0 %v510_v14 }
 0x2ab   :  { %1072 = vmatpush3.msra.mxu0 %v510_v14 }
 0x2ac   :  { %1074 = vmatmul.mubr.msk.f32.vlgmr.msra.gmra.mxu0 %vm149_vm0, %v917_v19  ;;  %1076 = vmatprep.subr.mxu0 %v511_v12 }
 0x2ad   :  { %1077 = vmatpush3.msra.mxu0 %v511_v12  ;;  %1080 = vmatprep.mubr.msk.f32.mxu0 %vm149_vm0, %v920_v18  ;;  %v832_v12 = vrot.slane %v1325_v15, %v831_v11 }
 0x2ae   :  { %1078 = vmatprep.subr.mxu0 %v510_v14 }
 0x2af   :  { %1079 = vmatpush3.msra.mxu0 %v510_v14 }
 0x2b0   :  { %1081 = vmatmul.mubr.msk.f32.vlgmr.msra.gmra.mxu0 %vm149_vm0, %v921_v21  ;;  %1083 = vmatprep.subr.mxu0 %v142_v20 }
 0x2b1   :  { %v1143_v23 = vpop.eup %1142  ;;  %1084 = vmatpush3.msra.mxu0 %v142_v20 }
 0x2b2   :  { %1085 = vmatprep.subr.mxu0 %v141_v22  ;;  %v515_v25 = vmul.f32 0.6931472, %v1143_v23 }
 0x2b3   :  { %v1145_v26 = vpop.eup %1144  ;;  %1086 = vmatpush3.msra.mxu0 %v141_v22 }
 0x2b4   :  { %1087 = vmatprep.subr.mxu0 %v140_v24  ;;  %v513_v28 = vmul.f32 0.6931472, %v1145_v26  ;;  %v517_v29 = vmul.f32 2.0, %v515_v25 }
 0x2b5   :  { %1088 = vmatpush3.msra.mxu0 %v140_v24 }
 0x2b6   :  { %1089 = vmatprep.subr.mxu0 %v139_v27  ;;  %v516_v36 = vmul.f32 2.0, %v513_v28  ;;  %v519_v32 = vadd.f32 1.0, %v517_v29 }
 0x2b7   :  { %1090 = vmatpush3.msra.mxu0 %v139_v27 }
 0x2b8   :  { %1091 = vmatprep.subr.mxu0 %v138_v30  ;;  %v518_v35 = vadd.f32 1.0, %v516_v36  ;;  %v523_v37 = vsub.f32 %v519_v32, %v521_v31 }
 0x2b9   :  { %1092 = vmatpush3.msra.mxu0 %v138_v30 }
 0x2ba   :  { %1093 = vmatprep.subr.mxu0 %v137_v33  ;;  %v522_v40 = vsub.f32 %v518_v35, %v520_v34  ;;  %v527_v42 = vsub.f32 %v523_v37, %v525_v38 }
 0x2bb   :  { %1094 = vmatpush3.msra.mxu0 %v137_v33 }
 0x2bc   :  { %1095 = vmatprep.subr.mxu0 %v136_v39  ;;  %v526_v44 = vsub.f32 %v522_v40, %v524_v41  ;;  %v529_v47 = vmul.f32 -0.5, %v527_v42 }
 0x2bd   :  { %1096 = vmatpush3.msra.mxu0 %v136_v39 }
 0x2be   :  { %1097 = vmatprep.subr.mxu0 %v135_v43  ;;  %v528_v46 = vmul.f32 -0.5, %v526_v44 }
 0x2bf   :  { %1098 = vmatpush3.msra.mxu0 %v135_v43 }
 0x2c0   :  { %1099 = vmatprep.subr.mxu0 %v134_v45  ;;  %v530_v49 = vadd.f32 %v529_v47, %v528_v46 }
 0x2c1   :  { %1100 = vmatpush3.msra.mxu0 %v134_v45 }
 0x2c2   :  { %1101 = vmatprep.subr.mxu0 %v133_v48 }
 0x2c3   :  { %1102 = vmatpush3.msra.mxu0 %v133_v48 }
 0x2c4   :  { %1103 = vmatprep.subr.mxu0 %v132_v50 }
 0x2c5   :  { %1104 = vmatpush3.msra.mxu0 %v132_v50 }
 0x2c6   :  { %1105 = vmatprep.subr.mxu0 %v131_v51 }
 0x2c7   :  { %1106 = vmatpush3.msra.mxu0 %v131_v51 }
 0x2c8   :  { %1107 = vmatprep.subr.mxu0 %v130_v52 }
 0x2c9   :  { %1108 = vmatpush3.msra.mxu0 %v130_v52 }
 0x2ca   :  { %1109 = vmatprep.subr.mxu0 %v129_v53 }
 0x2cb   :  { %1110 = vmatpush3.msra.mxu0 %v129_v53 }
 0x2cc   :  { %1111 = vmatprep.subr.mxu0 %v128_v54 }
 0x2cd   :  { %1112 = vmatpush3.msra.mxu0 %v128_v54 }
 0x2ce   :  { %1113 = vmatprep.subr.mxu0 %v127_v55 }
 0x2cf   :  { %1114 = vmatpush3.msra.mxu0 %v127_v55 }
 0x36c   :  { %v1075_v56 = vpop.f32.mrf.mxu0 }
 0x36e   :  { %v644_v57 = vpop.f32.mrf.mxu0 }
 0x370   :  { %v1082_v58 = vpop.f32.mrf.mxu0 }
 0x371   :  { %v735_v59 = vmul.f32 %v1082_v58, %v1075_v56 }
 0x372   :  { %v725_v60 = vpop.f32.mrf.mxu0 }
 0x373   :  { %v734_v61 = vmul.f32 %v725_v60, %v644_v57  ;;  %v737_v63 = vmax.f32 %v735_v59, 0.0 }
 0x375   :  { %v736_v62 = vmax.f32 %v734_v61, 0.0 }
 0x377   :  { %1115 = vmatprep.mubr.f32.mxu0 %v736_v62 }
 0x378   :  { %1116 = vmatmul.mubr.f32.vlgmr.msra.gmra.mxu0 %v737_v63 }
 0x438   :  { %v1117_v2 = vpop.f32.mrf.mxu0 }
 0x439   :  { %v814_v3 = vadd.f32 %v1117_v2, %v741_v1 }
 0x43a   :  { %v808_v5 = vpop.f32.mrf.mxu0 }
 0x43b   :  { %v818_v6 = vmax.f32 %v814_v3, 0.0  ;;  %v809_v7 = vadd.f32 %v808_v5, %v741_v1 }
 0x43d   :  { %v817_v8 = vmax.f32 %v809_v7, 0.0  ;;  %v824_v9 = vmul.f32 %v822_v4, %v818_v6 }
 0x43f   :  { %827 = vadd.xlane.f32.xlu1 %v824_v9  ;;  %v823_v10 = vmul.f32 %v822_v4, %v817_v8 }
 0x441   :  { %825 = vadd.xlane.f32.xlu0 %v823_v10 }
 0x445   :  { %531 = vadd.xlane.f32.xlu0 %v530_v49 }
 0x4c8   :  { %v828_v14 = vpop.xlane.xlu1 %827 }
 0x4c9   :  { %v834_v17 = vadd.f32 %v832_v12, %v828_v14 }
 0x4ca   :  { %v826_v18 = vpop.xlane.xlu0 %825 }
 0x4cb   :  { %v847_v19 = vand.u32 2147483647, %v834_v17  ;;  %v833_v20 = vadd.f32 %v832_v12, %v826_v18  ;;  %v845_v43 = vmax.f32 %v834_v17, 0.0 }
 0x4cd   :  { %v849_v21 = vsub.f32 0.0, %v847_v19  ;;  %v842_v16 = vmul.f32 -1.0, %v833_v20 }
 0x4ce   :  { %v532_v22 = vpop.xlane.xlu0 %531 }
 0x4cf   :  { %v852_v23 = vmul.f32 1.442695, %v849_v21  ;;  %v846_v24 = vand.u32 2147483647, %v842_v16  ;;  %v533_v25 = vrot.slane %v532_v22, 4  ;;  %v844_v50 = vmax.f32 %v842_v16, 0.0 }
 0x4d1   :  { %1146 = vpow2.f32 %v852_v23  ;;  %v848_v26 = vsub.f32 0.0, %v846_v24  ;;  %v534_v27 = vadd.f32 %v533_v25, %v532_v22 }
 0x4d3   :  { %v850_v28 = vmul.f32 1.442695, %v848_v26  ;;  %v535_v29 = vrot.slane %v534_v27, 2 }
 0x4d5   :  { %1148 = vpow2.f32 %v850_v28  ;;  %v536_v13 = vadd.f32 %v535_v29, %v534_v27 }
 0x4d7   :  { %v537_v30 = vrot.slane %v536_v13, 1 }
 0x4d9   :  { %v538_v15 = vadd.f32 %v537_v30, %v536_v13 }
 0x4db   :  { %1118 = vpush %v538_v15 }
 0x4de   :  { %v1147_v31 = vpop.eup %1146 }
 0x4df   :  { %v863_v36 = vadd.f32 1.0, %v1147_v31  ;;  %v866_v34 = vmul.f32 -0.5, %v1147_v31  ;;  %v869_v38 = vand.u32 2147483647, %v1147_v31 }
 0x4e1   :  { %1150 = vlog2.f32 %v863_v36  ;;  %v867_v35 = vadd.f32 1.0, %v866_v34  ;;  %vm870_vm9 = vcmp.lt.f32.partialorder %v869_v38, 0.0004427343 }
 0x4e2   :  { %v1149_v32 = vpop.eup %1148 }
 0x4e3   :  { %v854_v33 = vadd.f32 1.0, %v1149_v32  ;;  %v857_v37 = vmul.f32 -0.5, %v1149_v32  ;;  %v868_v41 = vmul.f32 %v1147_v31, %v867_v35  ;;  %v860_v44 = vand.u32 2147483647, %v1149_v32 }
 0x4e5   :  { %1152 = vlog2.f32 %v854_v33  ;;  %v858_v42 = vadd.f32 1.0, %v857_v37  ;;  %vm861_vm10 = vcmp.lt.f32.partialorder %v860_v44, 0.0004427343 }
 0x4e7   :  { %v859_v49 = vmul.f32 %v1149_v32, %v858_v42 }
 0x4ee   :  { %v1151_v39 = vpop.eup %1150 }
 0x4ef   :  { %v865_v40 = vmul.f32 0.6931472, %v1151_v39 }
 0x4f1   :  { %v871_v45 = vsel %vm870_vm9, %v868_v41, %v865_v40 }
 0x4f2   :  { %v1153_v46 = vpop.eup %1152  ;;  %v873_v47 = vadd.f32 %v871_v45, %v845_v43 }
 0x4f3   :  { %v856_v48 = vmul.f32 0.6931472, %v1153_v46 }
 0x4f4   :  { %v875_v53 = vmin.f32 %v873_v47, 100.0 }
 0x4f5   :  { %v862_v51 = vsel %vm861_vm10, %v859_v49, %v856_v48 }
 0x4f6   :  { %v872_v52 = vadd.f32 %v862_v51, %v844_v50  ;;  %v878_v56 = vsel %vm876_vm11, %v875_v53, 0.0 }
 0x4f8   :  { %v874_v54 = vmin.f32 %v872_v52, 100.0 }
 0x4fa   :  { %v877_v55 = vsel %vm876_vm11, %v874_v54, 0.0 }
 0x4fb   :  { %v879_v57 = vadd.f32 %v878_v56, %v877_v55 }
 0x4fd   :  { %880 = vadd.xlane.f32.xlu0 %v879_v57 }
 0x50c   :  { %s1119_s3 = spop %1118 }
 0x50d   :  { %v540_v1 = vstv %s1119_s3 }
 0x50e   :  { %v893_v2 = vmul.f32 0.0625, %v540_v1 }
 0x510   :  { %v894_v4 = vmul.f32 0.1, %v893_v2 }
 0x586   :  { %v881_v58 = vpop.xlane.xlu0 %880 }
 0x587   :  { %v882_v59 = vrot.slane %v881_v58, 4 }
 0x589   :  { %v883_v60 = vadd.f32 %v882_v59, %v881_v58 }
 0x58b   :  { %v884_v61 = vrot.slane %v883_v60, 2 }
 0x58d   :  { %v885_v62 = vadd.f32 %v884_v61, %v883_v60 }
 0x58f   :  { %v886_v63 = vrot.slane %v885_v62, 1 }
 0x591   :  { %v887_v0 = vadd.f32 %v886_v63, %v885_v62 }
 0x593   :  { %1120 = vpush %v887_v0 }
 0x5c4   :  { %s1121_s27 = spop %1120 }
 0x5c5   :  { %v889_v3 = vstv %s1121_s27 }
 0x5c6   :  { %v891_v5 = vmul.f32 0.125, %v889_v3 }
 0x5c8   :  { %v895_v6 = vadd.f32 %v894_v4, %v891_v5 }
 0x5ca   :  { %897 = vst.msk [vmem:[#allocation8] sm:$0x1] %vm896_vm12, %v895_v6 }
 0x5cb   :  { %1225 = shalt.err (!%p1222_p5)
}
 0x5cc   :  { %907 = dma.vmem_to_hbm [thread:$0]  %s905_s29, 16, %s1362_s6, [#allocation4]  }
 0x5cd   :  { %1238 = dma.done.wait [#allocation4], 16  }
 0x5ce   :  { %1239 = vsyncadd [#allocation4], 4294967280 }
 0x5cf   :  { %911 = vsyncpa [#allocation3], 1 }
 0x5d0   :  { %912 = vsyncpa [#allocation6], 1 }
 0x5d1   :  { %913 = vsyncpa [#allocation4], 1 }

</bundles_post_ra>
